<compile_context>
chip_gen: v7x
topology: tpu7x:2x2x1
jax: 0.10.0
libtpu: 0.0.40
codegen_flags: <defaults>
</compile_context>

<pallas_src>
import jax
import jax.numpy as jnp
from jax.experimental import pallas as pl
from jax.experimental.pallas import tpu as pltpu  # noqa: F401  (TPU backend assumed)


def _mine_infomax_kernel(x_ref, z_ref, zp_ref,
                         w1x_ref, w1z_ref, b1_ref,
                         w2_ref, b2_ref,
                         w3_ref, b3_ref,
                         w4_ref, b4_ref,
                         w5t_ref, b5_ref,
                         out_ref):
    B = x_ref.shape[0]

    def dot_bf16(a, w_ref):
        # bf16 x bf16 MXU matmul with f32 accumulation.
        return jnp.dot(a.astype(jnp.bfloat16), w_ref[...],
                       preferred_element_type=jnp.float32)

    # ---- Layer 1 (split contraction, shared x partial product) -------------
    # real rows use z, fake rows use z_perm; x @ W1[:X] is computed once and
    # reused for both halves of the fused (2B, H1) batch.
    hx = dot_bf16(x_ref[...], w1x_ref)                           # (B, H1)
    z_both = jnp.concatenate([z_ref[...], zp_ref[...]], axis=0)  # (2B, Z)
    hz = dot_bf16(z_both, w1z_ref)                               # (2B, H1)
    h = jnp.concatenate([hx, hx], axis=0) + hz + b1_ref[...]     # (2B, H1)
    h = jnp.maximum(h, 0.0)

    # ---- Hidden layers, fused real+fake batch ------------------------------
    h = jnp.maximum(dot_bf16(h, w2_ref) + b2_ref[...], 0.0)      # (2B, H2)
    h = jnp.maximum(dot_bf16(h, w3_ref) + b3_ref[...], 0.0)      # (2B, H3)
    h = jnp.maximum(dot_bf16(h, w4_ref) + b4_ref[...], 0.0)      # (2B, H4)

    h_real = h[:B]                                               # (B, H4)
    h_fake = h[B:]                                               # (B, H4)

    # ---- Final (H4 -> 1) layer + fdiv reduction, all f32 on VPU/XLU ---------
    # Real branch: mean(h_real @ w5 + b5) == mean(h_real, 0) @ w5 + b5.
    w5t = w5t_ref[...]                                           # (1, H4) f32
    d_fake = jnp.sum(h_fake * w5t, axis=1, keepdims=True) + b5_ref[...]        # (B, 1)
    mean_h_real = jnp.mean(h_real, axis=0, keepdims=True)                      # (1, H4)
    d_real_mean = jnp.sum(mean_h_real * w5t, axis=1, keepdims=True) + b5_ref[...]  # (1, 1)

    # loss_type == 'fdiv':  -mean(d_real) + mean(exp(d_fake - 1))
    out_ref[...] = -d_real_mean + jnp.mean(jnp.exp(d_fake - 1.0))


def mine_infomax_fdiv(x, z, z_perm, params):
    """MineInfoMax fdiv loss (forward only). Returns a (1, 1) f32 array."""
    (w1, b1), (w2, b2), (w3, b3), (w4, b4), (w5, b5) = params
    x_dim = x.shape[1]

    # bf16 weights for the MXU layers (f32 accumulation happens in-kernel);
    # the tiny final projection stays f32 and is passed transposed as (1, H4).
    w1x = w1[:x_dim].astype(jnp.bfloat16)   # rows that contract with x
    w1z = w1[x_dim:].astype(jnp.bfloat16)   # rows that contract with z / z_perm
    w2b = w2.astype(jnp.bfloat16)
    w3b = w3.astype(jnp.bfloat16)
    w4b = w4.astype(jnp.bfloat16)
    w5t = jnp.transpose(w5)                 # (1, H4) float32

    operands = (x, z, z_perm, w1x, w1z, b1, w2b, b2, w3b, b3, w4b, b4, w5t, b5)

    # TODO(synk): at the original layer sizes (200000/50000/12000/3000) the
    # weights do not fit in VMEM (w2 does not even fit v5e HBM); that variant
    # needs a grid over output-feature / K tiles with double-buffered bf16 (or
    # int8 on v5e/v6e) weight streaming sized for v7x's 64 MiB VMEM, with
    # 'parallel' grid axes to use both v7x TensorCores — not whole-array blocks.
    return pl.pallas_call(
        _mine_infomax_kernel,
        out_shape=jax.ShapeDtypeStruct((1, 1), jnp.float32),
        # grid-less single invocation; default specs stage whole arrays in VMEM.
    )(*operands)


def init_params(key, dims):
    """Deterministic Linear params; W:(in,out), b:(1,out) — PyTorch-style init."""
    params = []
    for d_in, d_out in zip(dims[:-1], dims[1:]):
        key, kw, kb = jax.random.split(key, 3)
        scale = 1.0 / jnp.sqrt(jnp.float32(d_in))
        w = jax.random.uniform(kw, (d_in, d_out), jnp.float32, -scale, scale)
        b = jax.random.uniform(kb, (1, d_out), jnp.float32, -scale, scale)
        params.append((w, b))
    return params


if __name__ == "__main__":
    # Small, lane-dense (multiples of 128) TPU-friendly stand-ins for the
    # module's giant MLP (original: x_dim+z_dim -> 200000 -> 50000 -> 12000
    # -> 3000 -> 1).
    B = 8
    X_DIM = 128
    Z_DIM = 128
    HIDDEN = [256, 256, 128, 128]
    dims = [X_DIM + Z_DIM] + HIDDEN + [1]

    key = jax.random.PRNGKey(0)
    kx, kz, kperm, kp = jax.random.split(key, 4)

    x = jax.random.normal(kx, (B, X_DIM), jnp.float32)
    z = jax.random.normal(kz, (B, Z_DIM), jnp.float32)

    # _permute_dims: permute z along the batch axis (torch.randperm equivalent).
    perm = jax.random.permutation(kperm, B)
    z_perm = z[perm]

    params = init_params(kp, dims)

    loss = mine_infomax_fdiv(x, z, z_perm, params)
    jax.block_until_ready(loss)
    got = loss[0, 0]

    # ---- Pure-JAX references -------------------------------------------------
    def ref_loss(emulate_bf16):
        n = len(params)

        def mlp(inp):
            h = inp
            for i, (w, b) in enumerate(params):
                if emulate_bf16 and i < n - 1:
                    h = jnp.dot(h.astype(jnp.bfloat16), w.astype(jnp.bfloat16),
                                preferred_element_type=jnp.float32) + b
                else:
                    h = jnp.dot(h, w, preferred_element_type=jnp.float32) + b
                if i < n - 1:
                    h = jnp.maximum(h, 0.0)
            return h

        xz_r = jnp.concatenate([x, z], axis=1)
        xz_f = jnp.concatenate([x, z_perm], axis=1)
        return -jnp.mean(mlp(xz_r)) + jnp.mean(jnp.exp(mlp(xz_f) - 1.0))

    ref_bf16 = ref_loss(emulate_bf16=True)    # same bf16-weight/activation math
    ref_f32 = ref_loss(emulate_bf16=False)    # module semantics in full f32

    assert jnp.allclose(got, ref_bf16, atol=5e-3, rtol=5e-3), (got, ref_bf16)
    assert jnp.allclose(got, ref_f32, atol=3e-2, rtol=3e-2), (got, ref_f32)

    print("KERNEL_OK")
</pallas_src>

<mosaic_0001>
module attributes {stable_mosaic.version = 11 : i64} {
  func.func @_mine_infomax_kernel(%arg0: memref<8x128xf32, #tpu.memory_space<vmem>>, %arg1: memref<8x128xf32, #tpu.memory_space<vmem>>, %arg2: memref<8x128xf32, #tpu.memory_space<vmem>>, %arg3: memref<128x256xbf16, #tpu.memory_space<vmem>>, %arg4: memref<128x256xbf16, #tpu.memory_space<vmem>>, %arg5: memref<1x256xf32, #tpu.memory_space<vmem>>, %arg6: memref<256x256xbf16, #tpu.memory_space<vmem>>, %arg7: memref<1x256xf32, #tpu.memory_space<vmem>>, %arg8: memref<256x128xbf16, #tpu.memory_space<vmem>>, %arg9: memref<1x128xf32, #tpu.memory_space<vmem>>, %arg10: memref<128x128xbf16, #tpu.memory_space<vmem>>, %arg11: memref<1x128xf32, #tpu.memory_space<vmem>>, %arg12: memref<1x128xf32, #tpu.memory_space<vmem>>, %arg13: memref<1x1xf32, #tpu.memory_space<vmem>>, %arg14: memref<1x1xf32, #tpu.memory_space<vmem>>) attributes {dimension_semantics = [], scalar_prefetch = 0 : i64, scratch_operands = 0 : i64, tpu.core_type = #tpu.core_type<tc>} {
    %c0 = arith.constant 0 : index
    %c0_0 = arith.constant 0 : index
    %0 = vector.load %arg0[%c0, %c0_0] : memref<8x128xf32, #tpu.memory_space<vmem>>, vector<8x128xf32>
    %1 = arith.truncf %0 : vector<8x128xf32> to vector<8x128xbf16>
    %c0_1 = arith.constant 0 : index
    %c0_2 = arith.constant 0 : index
    %2 = vector.load %arg3[%c0_1, %c0_2] : memref<128x256xbf16, #tpu.memory_space<vmem>>, vector<128x256xbf16>
    %cst = arith.constant dense<0.000000e+00> : vector<8x256xf32>
    %3 = tpu.matmul %1, %2, %cst {dimension_numbers = #tpu.dot_dimension_numbers<[1], [0], [0], [1], [0, 0, 1, 1], [], []>} : vector<8x128xbf16>, vector<128x256xbf16>, vector<8x256xf32> -> vector<8x256xf32>
    %c0_3 = arith.constant 0 : index
    %c0_4 = arith.constant 0 : index
    %4 = vector.load %arg1[%c0_3, %c0_4] : memref<8x128xf32, #tpu.memory_space<vmem>>, vector<8x128xf32>
    %c0_5 = arith.constant 0 : index
    %c0_6 = arith.constant 0 : index
    %5 = vector.load %arg2[%c0_5, %c0_6] : memref<8x128xf32, #tpu.memory_space<vmem>>, vector<8x128xf32>
    %6 = tpu.concatenate %4, %5 in 0 : vector<8x128xf32>, vector<8x128xf32> -> vector<16x128xf32>
    %7 = arith.truncf %6 : vector<16x128xf32> to vector<16x128xbf16>
    %c0_7 = arith.constant 0 : index
    %c0_8 = arith.constant 0 : index
    %8 = vector.load %arg4[%c0_7, %c0_8] : memref<128x256xbf16, #tpu.memory_space<vmem>>, vector<128x256xbf16>
    %cst_9 = arith.constant dense<0.000000e+00> : vector<16x256xf32>
    %9 = tpu.matmul %7, %8, %cst_9 {dimension_numbers = #tpu.dot_dimension_numbers<[1], [0], [0], [1], [0, 0, 1, 1], [], []>} : vector<16x128xbf16>, vector<128x256xbf16>, vector<16x256xf32> -> vector<16x256xf32>
    %10 = tpu.concatenate %3, %3 in 0 : vector<8x256xf32>, vector<8x256xf32> -> vector<16x256xf32>
    %11 = arith.addf %10, %9 : vector<16x256xf32>
    %c0_10 = arith.constant 0 : index
    %c0_11 = arith.constant 0 : index
    %12 = vector.load %arg5[%c0_10, %c0_11] : memref<1x256xf32, #tpu.memory_space<vmem>>, vector<1x256xf32>
    %13 = vector.broadcast %12 : vector<1x256xf32> to vector<16x256xf32>
    %14 = arith.addf %11, %13 : vector<16x256xf32>
    %cst_12 = arith.constant 0.000000e+00 : f32
    %15 = vector.broadcast %cst_12 : f32 to vector<16x256xf32>
    %16 = arith.maximumf %14, %15 : vector<16x256xf32>
    %17 = arith.truncf %16 : vector<16x256xf32> to vector<16x256xbf16>
    %c0_13 = arith.constant 0 : index
    %c0_14 = arith.constant 0 : index
    %18 = vector.load %arg6[%c0_13, %c0_14] : memref<256x256xbf16, #tpu.memory_space<vmem>>, vector<256x256xbf16>
    %cst_15 = arith.constant dense<0.000000e+00> : vector<16x256xf32>
    %19 = tpu.matmul %17, %18, %cst_15 {dimension_numbers = #tpu.dot_dimension_numbers<[1], [0], [0], [1], [0, 0, 1, 1], [], []>} : vector<16x256xbf16>, vector<256x256xbf16>, vector<16x256xf32> -> vector<16x256xf32>
    %c0_16 = arith.constant 0 : index
    %c0_17 = arith.constant 0 : index
    %20 = vector.load %arg7[%c0_16, %c0_17] : memref<1x256xf32, #tpu.memory_space<vmem>>, vector<1x256xf32>
    %21 = vector.broadcast %20 : vector<1x256xf32> to vector<16x256xf32>
    %22 = arith.addf %19, %21 : vector<16x256xf32>
    %cst_18 = arith.constant 0.000000e+00 : f32
    %23 = vector.broadcast %cst_18 : f32 to vector<16x256xf32>
    %24 = arith.maximumf %22, %23 : vector<16x256xf32>
    %25 = arith.truncf %24 : vector<16x256xf32> to vector<16x256xbf16>
    %c0_19 = arith.constant 0 : index
    %c0_20 = arith.constant 0 : index
    %26 = vector.load %arg8[%c0_19, %c0_20] : memref<256x128xbf16, #tpu.memory_space<vmem>>, vector<256x128xbf16>
    %cst_21 = arith.constant dense<0.000000e+00> : vector<16x128xf32>
    %27 = tpu.matmul %25, %26, %cst_21 {dimension_numbers = #tpu.dot_dimension_numbers<[1], [0], [0], [1], [0, 0, 1, 1], [], []>} : vector<16x256xbf16>, vector<256x128xbf16>, vector<16x128xf32> -> vector<16x128xf32>
    %c0_22 = arith.constant 0 : index
    %c0_23 = arith.constant 0 : index
    %28 = vector.load %arg9[%c0_22, %c0_23] : memref<1x128xf32, #tpu.memory_space<vmem>>, vector<1x128xf32>
    %29 = vector.broadcast %28 : vector<1x128xf32> to vector<16x128xf32>
    %30 = arith.addf %27, %29 : vector<16x128xf32>
    %cst_24 = arith.constant 0.000000e+00 : f32
    %31 = vector.broadcast %cst_24 : f32 to vector<16x128xf32>
    %32 = arith.maximumf %30, %31 : vector<16x128xf32>
    %33 = arith.truncf %32 : vector<16x128xf32> to vector<16x128xbf16>
    %c0_25 = arith.constant 0 : index
    %c0_26 = arith.constant 0 : index
    %34 = vector.load %arg10[%c0_25, %c0_26] : memref<128x128xbf16, #tpu.memory_space<vmem>>, vector<128x128xbf16>
    %cst_27 = arith.constant dense<0.000000e+00> : vector<16x128xf32>
    %35 = tpu.matmul %33, %34, %cst_27 {dimension_numbers = #tpu.dot_dimension_numbers<[1], [0], [0], [1], [0, 0, 1, 1], [], []>} : vector<16x128xbf16>, vector<128x128xbf16>, vector<16x128xf32> -> vector<16x128xf32>
    %c0_28 = arith.constant 0 : index
    %c0_29 = arith.constant 0 : index
    %36 = vector.load %arg11[%c0_28, %c0_29] : memref<1x128xf32, #tpu.memory_space<vmem>>, vector<1x128xf32>
    %37 = vector.broadcast %36 : vector<1x128xf32> to vector<16x128xf32>
    %38 = arith.addf %35, %37 : vector<16x128xf32>
    %cst_30 = arith.constant 0.000000e+00 : f32
    %39 = vector.broadcast %cst_30 : f32 to vector<16x128xf32>
    %40 = arith.maximumf %38, %39 : vector<16x128xf32>
    %41 = vector.extract_strided_slice %40 {offsets = [0, 0], sizes = [8, 128], strides = [1, 1]} : vector<16x128xf32> to vector<8x128xf32>
    %42 = vector.extract_strided_slice %40 {offsets = [8, 0], sizes = [8, 128], strides = [1, 1]} : vector<16x128xf32> to vector<8x128xf32>
    %c0_31 = arith.constant 0 : index
    %c0_32 = arith.constant 0 : index
    %43 = vector.load %arg12[%c0_31, %c0_32] : memref<1x128xf32, #tpu.memory_space<vmem>>, vector<1x128xf32>
    %44 = vector.broadcast %43 : vector<1x128xf32> to vector<8x128xf32>
    %45 = arith.mulf %42, %44 : vector<8x128xf32>
    %cst_33 = arith.constant dense<0.000000e+00> : vector<8xf32>
    %46 = vector.multi_reduction <add>, %45, %cst_33 [1] : vector<8x128xf32> to vector<8xf32>
    %47 = vector.shape_cast %46 : vector<8xf32> to vector<8x1xf32>
    %c0_34 = arith.constant 0 : index
    %c0_35 = arith.constant 0 : index
    %48 = vector.load %arg13[%c0_34, %c0_35] : memref<1x1xf32, #tpu.memory_space<vmem>>, vector<1x1xf32>
    %49 = vector.broadcast %48 : vector<1x1xf32> to vector<8x1xf32>
    %50 = arith.addf %47, %49 : vector<8x1xf32>
    %cst_36 = arith.constant dense<0.000000e+00> : vector<128xf32>
    %51 = vector.multi_reduction <add>, %41, %cst_36 [0] : vector<8x128xf32> to vector<128xf32>
    %52 = vector.shape_cast %51 : vector<128xf32> to vector<1x128xf32>
    %cst_37 = arith.constant 8.000000e+00 : f32
    %53 = vector.broadcast %cst_37 : f32 to vector<1x128xf32>
    %54 = arith.divf %52, %53 : vector<1x128xf32>
    %55 = arith.mulf %54, %43 : vector<1x128xf32>
    %cst_38 = arith.constant dense<0.000000e+00> : vector<1xf32>
    %56 = vector.multi_reduction <add>, %55, %cst_38 [1] : vector<1x128xf32> to vector<1xf32>
    %57 = vector.shape_cast %56 : vector<1xf32> to vector<1x1xf32>
    %c0_39 = arith.constant 0 : index
    %c0_40 = arith.constant 0 : index
    %58 = vector.load %arg13[%c0_39, %c0_40] : memref<1x1xf32, #tpu.memory_space<vmem>>, vector<1x1xf32>
    %59 = arith.addf %57, %58 : vector<1x1xf32>
    %cst_41 = arith.constant 0.000000e+00 : f32
    %60 = vector.broadcast %cst_41 : f32 to vector<1x1xf32>
    %61 = arith.subf %60, %59 : vector<1x1xf32>
    %cst_42 = arith.constant 1.000000e+00 : f32
    %62 = vector.broadcast %cst_42 : f32 to vector<8x1xf32>
    %63 = arith.subf %50, %62 : vector<8x1xf32>
    %64 = math.exp %63 : vector<8x1xf32>
    %65 = vector.shape_cast %64 : vector<8x1xf32> to vector<1x8x1xf32>
    %cst_43 = arith.constant dense<0.000000e+00> : vector<1xf32>
    %66 = vector.multi_reduction <add>, %65, %cst_43 [1, 2] : vector<1x8x1xf32> to vector<1xf32>
    %67 = vector.shape_cast %66 : vector<1xf32> to vector<1x1x1xf32>
    %68 = vector.extract %67[0, 0, 0] : f32 from vector<1x1x1xf32>
    %cst_44 = arith.constant 8.000000e+00 : f32
    %69 = arith.divf %68, %cst_44 : f32
    %70 = vector.broadcast %69 : f32 to vector<1x1xf32>
    %71 = arith.addf %61, %70 : vector<1x1xf32>
    %c0_45 = arith.constant 0 : index
    %c0_46 = arith.constant 0 : index
    %72 = vector.load %arg14[%c0_45, %c0_46] : memref<1x1xf32, #tpu.memory_space<vmem>>, vector<1x1xf32>
    tpu.vector_store %arg14[%c0_45, %c0_46], %71 {strides = array<i32>} : memref<1x1xf32, #tpu.memory_space<vmem>>, vector<1x1xf32>,
    return
  }
}

</mosaic_0001>

<bundles_post_ra>
// kernel: tpu_custom_call.1
= control target key start
LH: loop header
LB: loop body
LE: loop exit
PB: predicated region body
PF: predicated region fallthrough
CT: control target
= control target key end

     0   :  { %s1762_s0 = inlined_call_operand.hbm [shape: f32[8,128], index: 0, kind: input, shape index: {}]   ;;  %s1763_s1 = inlined_call_operand.hbm [shape: f32[8,128], index: 1, kind: input, shape index: {}]   ;;  %s1764_s2 = inlined_call_operand.vmem [shape: f32[8,128], index: 2, kind: input, shape index: {}]   ;;  %s1765_s3 = inlined_call_operand.hbm [shape: bf16[128,256], index: 3, kind: input, shape index: {}]   ;;  %s1766_s4 = inlined_call_operand.hbm [shape: bf16[128,256], index: 4, kind: input, shape index: {}]   ;;  %s1767_s5 = inlined_call_operand.vmem [shape: f32[1,256], index: 5, kind: input, shape index: {}]   ;;  %s1768_s6 = inlined_call_operand.hbm [shape: bf16[256,256], index: 6, kind: input, shape index: {}]   ;;  %s1769_s7 = inlined_call_operand.vmem [shape: f32[1,256], index: 7, kind: input, shape index: {}]   ;;  %s1770_s8 = inlined_call_operand.hbm [shape: bf16[256,128], index: 8, kind: input, shape index: {}]   ;;  %s1771_s9 = inlined_call_operand.vmem [shape: f32[1,128], index: 9, kind: input, shape index: {}]   ;;  %s1772_s10 = inlined_call_operand.hbm [shape: bf16[128,128], index: 10, kind: input, shape index: {}]   ;;  %s1773_s11 = inlined_call_operand.vmem [shape: f32[1,128], index: 11, kind: input, shape index: {}]   ;;  %s1774_s12 = inlined_call_operand.vmem [shape: f32[1,128], index: 12, kind: input, shape index: {}]   ;;  %s1775_s13 = inlined_call_operand.<no memory space> [shape: f32[1,1], index: 13, kind: input, shape index: {}]   ;;  %s1776_s14 = inlined_call_operand.hbm [shape: f32[1,1], index: 14, kind: output, shape index: {}]  }
   0x1   :  { %v19_v0 = vstv %s1775_s13 }
   0x2   :  { %20 = vst [vmem:[#allocation2] sm:$0x1] %v19_v0 }
   0x3   :  { %21 = vsyncpa [#allocation4], 0 }
   0x4   :  { %22 = vsyncpa [#allocation7], 0 }
   0x5   :  { %23 = vsyncpa [#allocation10], 0 }
   0x6   :  { %24 = vsyncpa [#allocation13], 0 }
   0x7   :  { %25 = vsyncpa [#allocation5], 0  ;;  %s1534_s15 = smov [#allocation6]   ;;  %s1348_s19 = scalar_lea.hbm %s1763_s1, 128 }
   0x8   :  { %s42_s16 = sshll.u32 %s1534_s15, 4  ;;  %p1349_p0 = scmp.ne.s32.totalorder %s1763_s1, %s1348_s19  ;;  %s43_s16 = int_to_ptr.vmem [resolvable:$true] %s42_s16 }
   0x9   :  { %p1352_p1 = scmp.lt.u32.totalorder %s1348_s19, %s1763_s1 }
   0xb   :  { %p1354_p2 = pnand %p1352_p1, %p1349_p0 }
   0xd   :  { %1357 = shalt.err (!%p1354_p2)
}
   0xe   :  { %s1358_s13 = scalar_lea.vmem %s43_s16, 128  ;;  %p1363_p4 = scmp.lt.s32.totalorder %s43_s16, %s43_s16 }
   0xf   :  { %p1359_p3 = scmp.ne.s32.totalorder %s43_s16, %s1358_s13  ;;  %p1364_p5 = scmp.lt.s32.totalorder %s1358_s13, %s1358_s13 }
  0x11   :  { %p1365_p6 = por %p1364_p5, %p1363_p4 }
  0x13   :  { %p1366_p7 = pnand %p1365_p6, %p1359_p3 }
  0x15   :  { %1369 = shalt.err (!%p1366_p7)
}
  0x16   :  { %45 = dma.hbm_to_vmem [thread:$0]  %s1763_s1, 128, %s43_s16, [#allocation7]  }
  0x17   :  { %s1535_s26 = smov [#allocation9]   ;;  %s1536_s28 = smov [#allocation12]  }
  0x18   :  { %s65_s27 = sshll.u32 %s1535_s26, 4  ;;  %s93_s29 = sshll.u32 %s1536_s28, 4  ;;  %s66_s27 = int_to_ptr.vmem [resolvable:$true] %s65_s27  ;;  %s94_s29 = int_to_ptr.vmem [resolvable:$true] %s93_s29 }
  0x19   :  { %s1370_s17 = scalar_lea.hbm %s1766_s4, 2048 }
  0x1a   :  { %p1371_p8 = scmp.ne.s32.totalorder %s1766_s4, %s1370_s17  ;;  %p1374_p9 = scmp.lt.u32.totalorder %s1370_s17, %s1766_s4 }
  0x1c   :  { %p1376_p10 = pnand %p1374_p9, %p1371_p8 }
  0x1e   :  { %1379 = shalt.err (!%p1376_p10)
}
  0x1f   :  { %s1380_s1 = scalar_lea.vmem %s66_s27, 2048  ;;  %p1385_p12 = scmp.lt.s32.totalorder %s66_s27, %s66_s27 }
  0x20   :  { %p1381_p11 = scmp.ne.s32.totalorder %s66_s27, %s1380_s1  ;;  %p1386_p13 = scmp.lt.s32.totalorder %s1380_s1, %s1380_s1 }
  0x22   :  { %p1387_p0 = por %p1386_p13, %p1385_p12 }
  0x24   :  { %p1388_p1 = pnand %p1387_p0, %p1381_p11 }
  0x26   :  { %1391 = shalt.err (!%p1388_p1)
}
  0x27   :  { %s1537_s16 = smov 128   ;;  %s1538_s22 = smov 8  }
  0x28   :  { %71 = dma.hbm_to_vmem [thread:$0]  %s1766_s4, 2048, %s66_s27, [#allocation10], %s1537_s16, %s1537_s16, %s1538_s22  }
  0x29   :  { %s1392_s26 = scalar_lea.hbm %s1770_s8, 2048 }
  0x2a   :  { %p1393_p2 = scmp.ne.s32.totalorder %s1770_s8, %s1392_s26  ;;  %p1396_p3 = scmp.lt.u32.totalorder %s1392_s26, %s1770_s8 }
  0x2c   :  { %p1398_p4 = pnand %p1396_p3, %p1393_p2 }
  0x2e   :  { %1401 = shalt.err (!%p1398_p4)
}
  0x2f   :  { %s1402_s18 = scalar_lea.vmem %s94_s29, 2048  ;;  %p1407_p6 = scmp.lt.s32.totalorder %s94_s29, %s94_s29 }
  0x30   :  { %p1403_p5 = scmp.ne.s32.totalorder %s94_s29, %s1402_s18  ;;  %p1408_p7 = scmp.lt.s32.totalorder %s1402_s18, %s1402_s18 }
  0x32   :  { %p1409_p8 = por %p1408_p7, %p1407_p6 }
  0x34   :  { %p1410_p9 = pnand %p1409_p8, %p1403_p5 }
  0x36   :  { %1413 = shalt.err (!%p1410_p9)
}
  0x37   :  { %s1539_s4 = smov 64   ;;  %s1540_s27 = smov 4  }
  0x38   :  { %99 = dma.hbm_to_vmem [thread:$0]  %s1770_s8, 2048, %s94_s29, [#allocation13], %s1539_s4, %s1539_s4, %s1540_s27  }
  0x39   :  { %s1541_s21 = smov [#allocation3]   ;;  %s1542_s23 = smov [#allocation8]  }
  0x3a   :  { %s32_s1 = sshll.u32 %s1541_s21, 4  ;;  %s53_s13 = sshll.u32 %s1542_s23, 4  ;;  %s33_s1 = int_to_ptr.vmem [resolvable:$true] %s32_s1  ;;  %s54_s13 = int_to_ptr.vmem [resolvable:$true] %s53_s13 }
  0x3b   :  { %s1414_s26 = scalar_lea.hbm %s1762_s0, 128 }
  0x3c   :  { %p1415_p10 = scmp.ne.s32.totalorder %s1762_s0, %s1414_s26  ;;  %p1418_p11 = scmp.lt.u32.totalorder %s1414_s26, %s1762_s0 }
  0x3e   :  { %p1420_p12 = pnand %p1418_p11, %p1415_p10 }
  0x40   :  { %1423 = shalt.err (!%p1420_p12)
}
  0x41   :  { %s1424_s8 = scalar_lea.vmem %s33_s1, 128  ;;  %p1429_p0 = scmp.lt.s32.totalorder %s33_s1, %s33_s1 }
  0x42   :  { %p1425_p13 = scmp.ne.s32.totalorder %s33_s1, %s1424_s8  ;;  %p1430_p1 = scmp.lt.s32.totalorder %s1424_s8, %s1424_s8 }
  0x44   :  { %p1431_p2 = por %p1430_p1, %p1429_p0 }
  0x46   :  { %p1432_p3 = pnand %p1431_p2, %p1425_p13 }
  0x48   :  { %1435 = shalt.err (!%p1432_p3)
}
  0x49   :  { %35 = dma.hbm_to_vmem [thread:$0]  %s1762_s0, 128, %s33_s1, [#allocation4]  }
  0x4a   :  { %s1436_s21 = scalar_lea.hbm %s1765_s3, 2048 }
  0x4b   :  { %p1437_p4 = scmp.ne.s32.totalorder %s1765_s3, %s1436_s21  ;;  %p1440_p5 = scmp.lt.u32.totalorder %s1436_s21, %s1765_s3 }
  0x4d   :  { %p1442_p6 = pnand %p1440_p5, %p1437_p4 }
  0x4f   :  { %1445 = shalt.err (!%p1442_p6)
}
  0x50   :  { %s1446_s28 = scalar_lea.vmem %s54_s13, 2048  ;;  %p1451_p8 = scmp.lt.s32.totalorder %s54_s13, %s54_s13 }
  0x51   :  { %p1447_p7 = scmp.ne.s32.totalorder %s54_s13, %s1446_s28  ;;  %p1452_p9 = scmp.lt.s32.totalorder %s1446_s28, %s1446_s28 }
  0x53   :  { %p1453_p10 = por %p1452_p9, %p1451_p8 }
  0x55   :  { %p1454_p11 = pnand %p1453_p10, %p1447_p7 }
  0x57   :  { %1457 = shalt.err (!%p1454_p11)
}
  0x58   :  { %59 = dma.hbm_to_vmem [thread:$0]  %s1765_s3, 2048, %s54_s13, [#allocation7], %s1537_s16, %s1537_s16, %s1538_s22  }
  0x59   :  { %s1543_s30 = smov [#allocation11]   ;;  %s1544_s17 = smov [#allocation14]  }
  0x5a   :  { %s79_s15 = sshll.u32 %s1543_s30, 4  ;;  %s107_s8 = sshll.u32 %s1544_s17, 4  ;;  %s80_s15 = int_to_ptr.vmem [resolvable:$true] %s79_s15  ;;  %s108_s8 = int_to_ptr.vmem [resolvable:$true] %s107_s8 }
  0x5b   :  { %s1458_s19 = scalar_lea.hbm %s1768_s6, 4096 }
  0x5c   :  { %p1459_p12 = scmp.ne.s32.totalorder %s1768_s6, %s1458_s19  ;;  %p1462_p13 = scmp.lt.u32.totalorder %s1458_s19, %s1768_s6 }
  0x5e   :  { %p1464_p0 = pnand %p1462_p13, %p1459_p12 }
  0x60   :  { %1467 = shalt.err (!%p1464_p0)
}
  0x61   :  { %s1468_s3 = scalar_lea.vmem %s80_s15, 4096  ;;  %p1473_p2 = scmp.lt.s32.totalorder %s80_s15, %s80_s15 }
  0x62   :  { %p1469_p1 = scmp.ne.s32.totalorder %s80_s15, %s1468_s3  ;;  %p1474_p3 = scmp.lt.s32.totalorder %s1468_s3, %s1468_s3 }
  0x64   :  { %p1475_p4 = por %p1474_p3, %p1473_p2 }
  0x66   :  { %p1476_p5 = pnand %p1475_p4, %p1469_p1 }
  0x68   :  { %1479 = shalt.err (!%p1476_p5)
}
  0x69   :  { %85 = dma.hbm_to_vmem [thread:$0]  %s1768_s6, 4096, %s80_s15, [#allocation10], %s1537_s16, %s1537_s16, %s1538_s22  }
  0x6a   :  { %s1480_s0 = scalar_lea.hbm %s1772_s10, 1024 }
  0x6b   :  { %p1481_p6 = scmp.ne.s32.totalorder %s1772_s10, %s1480_s0  ;;  %p1484_p7 = scmp.lt.u32.totalorder %s1480_s0, %s1772_s10 }
  0x6d   :  { %p1486_p8 = pnand %p1484_p7, %p1481_p6 }
  0x6f   :  { %1489 = shalt.err (!%p1486_p8)
}
  0x70   :  { %s1490_s18 = scalar_lea.vmem %s108_s8, 1024  ;;  %p1495_p10 = scmp.lt.s32.totalorder %s108_s8, %s108_s8 }
  0x71   :  { %p1491_p9 = scmp.ne.s32.totalorder %s108_s8, %s1490_s18  ;;  %p1496_p11 = scmp.lt.s32.totalorder %s1490_s18, %s1490_s18 }
  0x73   :  { %p1497_p12 = por %p1496_p11, %p1495_p10 }
  0x75   :  { %p1498_p13 = pnand %p1497_p12, %p1491_p9 }
  0x77   :  { %1501 = shalt.err (!%p1498_p13)
}
  0x78   :  { %113 = dma.hbm_to_vmem [thread:$0]  %s1772_s10, 1024, %s108_s8, [#allocation13], %s1539_s4, %s1539_s4, %s1540_s27  }
  0x79   :  { %1524 = dma.done.wait [#allocation4], 128  }
  0x7a   :  { %1525 = vsyncadd [#allocation4], 4294967168 }
  0x7b   :  { %1526 = dma.done.wait [#allocation7], 2176  }
  0x7c   :  { %1527 = vsyncadd [#allocation7], 4294965120 }
  0x7d   :  { %1528 = dma.done.wait [#allocation10], 6144  }
  0x7e   :  { %1529 = vsyncadd [#allocation10], 4294961152 }
  0x7f   :  { %1530 = dma.done.wait [#allocation13], 3072  }
  0x80   :  { %1531 = vsyncadd [#allocation13], 4294964224  ;;  %v1545_v1 = vmov 0   ;;  %v1226_v2 = vld [vmem:[#allocation8 + $0x4] ss:$8 sps:$4 sm:$0xff]   ;;  %v142_v34 = vld [vmem:[#allocation3] sm:$0xff] }
  0x81   :  { %272 = vmatprep.mubr.bf16.mxu0 %v1545_v1  ;;  %412 = vmatprep.mubr.bf16.mxu1 %v1545_v1  ;;  %v1228_v3 = vld [vmem:[#allocation9 + $0x4] ss:$8 sps:$4 sm:$0xff]   ;;  %v1230_v4 = vld [vmem:[#allocation8] ss:$8 sps:$4 sm:$0xff]   ;;  %v1232_v6 = vld [vmem:[#allocation8 + $0x14] ss:$8 sps:$4 sm:$0xff]   ;;  %v143_v38 = vpack.c.bf16 %v142_v34, %v142_v34 }
  0x82   :  { %240 = vmatprep.subr.bf16.mxu0 %v1226_v2  ;;  %v1231_v5 = vld [vmem:[#allocation9] ss:$8 sps:$4 sm:$0xff]   ;;  %380 = vmatprep.subr.bf16.mxu1 %v1228_v3  ;;  %v1234_v7 = vld [vmem:[#allocation9 + $0x14] ss:$8 sps:$4 sm:$0xff]   ;;  %v1236_v8 = vld [vmem:[#allocation8 + $0x10] ss:$8 sps:$4 sm:$0xff]  }
  0x83   :  { %241 = vmatpush1.bf16.msra.mxu0 %v1230_v4  ;;  %381 = vmatpush1.bf16.msra.mxu1 %v1231_v5  ;;  %v1237_v9 = vld [vmem:[#allocation9 + $0x10] ss:$8 sps:$4 sm:$0xff]   ;;  %v1238_v10 = vld [vmem:[#allocation8 + $0x24] ss:$8 sps:$4 sm:$0xff]   ;;  %v1242_v12 = vld [vmem:[#allocation8 + $0x20] ss:$8 sps:$4 sm:$0xff]  }
  0x84   :  { %242 = vmatprep.subr.bf16.mxu0 %v1232_v6  ;;  %382 = vmatprep.subr.bf16.mxu1 %v1234_v7  ;;  %v1240_v11 = vld [vmem:[#allocation9 + $0x24] ss:$8 sps:$4 sm:$0xff]   ;;  %v1243_v13 = vld [vmem:[#allocation9 + $0x20] ss:$8 sps:$4 sm:$0xff]   ;;  %v1244_v14 = vld [vmem:[#allocation8 + $0x34] ss:$8 sps:$4 sm:$0xff]  }
  0x85   :  { %v1246_v15 = vld [vmem:[#allocation9 + $0x34] ss:$8 sps:$4 sm:$0xff]   ;;  %v1248_v16 = vld [vmem:[#allocation8 + $0x30] ss:$8 sps:$4 sm:$0xff]   ;;  %v1250_v18 = vld [vmem:[#allocation8 + $0x44] ss:$8 sps:$4 sm:$0xff]  }
  0x86   :  { %v1249_v17 = vld [vmem:[#allocation9 + $0x30] ss:$8 sps:$4 sm:$0xff]   ;;  %v1252_v19 = vld [vmem:[#allocation9 + $0x44] ss:$8 sps:$4 sm:$0xff]   ;;  %v1254_v20 = vld [vmem:[#allocation8 + $0x40] ss:$8 sps:$4 sm:$0xff]  }
  0x87   :  { %243 = vmatpush1.bf16.msra.mxu0 %v1236_v8  ;;  %383 = vmatpush1.bf16.msra.mxu1 %v1237_v9  ;;  %v1255_v21 = vld [vmem:[#allocation9 + $0x40] ss:$8 sps:$4 sm:$0xff]   ;;  %v1256_v22 = vld [vmem:[#allocation8 + $0x54] ss:$8 sps:$4 sm:$0xff]   ;;  %v1260_v24 = vld [vmem:[#allocation8 + $0x50] ss:$8 sps:$4 sm:$0xff]  }
  0x88   :  { %244 = vmatprep.subr.bf16.mxu0 %v1238_v10  ;;  %384 = vmatprep.subr.bf16.mxu1 %v1240_v11  ;;  %v1258_v23 = vld [vmem:[#allocation9 + $0x54] ss:$8 sps:$4 sm:$0xff]   ;;  %v1261_v25 = vld [vmem:[#allocation9 + $0x50] ss:$8 sps:$4 sm:$0xff]   ;;  %v1262_v26 = vld [vmem:[#allocation8 + $0x64] ss:$8 sps:$4 sm:$0xff]  }
  0x89   :  { %v1264_v27 = vld [vmem:[#allocation9 + $0x64] ss:$8 sps:$4 sm:$0xff]   ;;  %v1266_v28 = vld [vmem:[#allocation8 + $0x60] ss:$8 sps:$4 sm:$0xff]   ;;  %v1268_v30 = vld [vmem:[#allocation8 + $0x74] ss:$8 sps:$4 sm:$0xff]  }
  0x8a   :  { %v1267_v29 = vld [vmem:[#allocation9 + $0x60] ss:$8 sps:$4 sm:$0xff]   ;;  %v1270_v31 = vld [vmem:[#allocation9 + $0x74] ss:$8 sps:$4 sm:$0xff]   ;;  %v1272_v32 = vld [vmem:[#allocation8 + $0x70] ss:$8 sps:$4 sm:$0xff]  }
  0x8b   :  { %245 = vmatpush1.bf16.msra.mxu0 %v1242_v12  ;;  %385 = vmatpush1.bf16.msra.mxu1 %v1243_v13  ;;  %v1273_v33 = vld [vmem:[#allocation9 + $0x70] ss:$8 sps:$4 sm:$0xff]   ;;  %v1276_v37 = vld [vmem:[#allocation11 + $0x4] ss:$8 sps:$4 sm:$0xff]   ;;  %v1274_v40 = vld [vmem:[#allocation11] ss:$8 sps:$4 sm:$0xff]  }
  0x8c   :  { %246 = vmatprep.subr.bf16.mxu0 %v1244_v14  ;;  %386 = vmatprep.subr.bf16.mxu1 %v1246_v15  ;;  %v281_v35 = vld [vmem:[#allocation6] sm:$0xff]  ;;  %v282_v36 = vld [vmem:[%s1764_s2] sm:$0xff]  ;;  %v1280_v44 = vld [vmem:[#allocation11 + $0x20] ss:$8 sps:$4 sm:$0xff]   ;;  %vm1547_vm0 = vmmov 0   ;;  %vm1022_vm1 = vcmask 1040384  }
  0x8d   :  { %v283_v39 = vpack.c.bf16 %v282_v36, %v281_v35  ;;  %v1279_v41 = vld [vmem:[#allocation11 + $0x14] ss:$8 sps:$4 sm:$0xff]   ;;  %v1277_v42 = vld [vmem:[#allocation11 + $0x10] ss:$8 sps:$4 sm:$0xff]   ;;  %v1282_v43 = vld [vmem:[#allocation11 + $0x24] ss:$8 sps:$4 sm:$0xff]  }
  0x8e   :  { %v1285_v45 = vld [vmem:[#allocation11 + $0x34] ss:$8 sps:$4 sm:$0xff]   ;;  %v1283_v46 = vld [vmem:[#allocation11 + $0x30] ss:$8 sps:$4 sm:$0xff]   ;;  %v1288_v47 = vld [vmem:[#allocation11 + $0x44] ss:$8 sps:$4 sm:$0xff]  }
  0x8f   :  { %247 = vmatpush1.bf16.msra.mxu0 %v1248_v16  ;;  %387 = vmatpush1.bf16.msra.mxu1 %v1249_v17  ;;  %v1286_v48 = vld [vmem:[#allocation11 + $0x40] ss:$8 sps:$4 sm:$0xff]   ;;  %v1291_v49 = vld [vmem:[#allocation11 + $0x54] ss:$8 sps:$4 sm:$0xff]   ;;  %v1289_v50 = vld [vmem:[#allocation11 + $0x50] ss:$8 sps:$4 sm:$0xff]  }
  0x90   :  { %248 = vmatprep.subr.bf16.mxu0 %v1250_v18  ;;  %388 = vmatprep.subr.bf16.mxu1 %v1252_v19  ;;  %v1294_v51 = vld [vmem:[#allocation11 + $0x64] ss:$8 sps:$4 sm:$0xff]   ;;  %v1292_v52 = vld [vmem:[#allocation11 + $0x60] ss:$8 sps:$4 sm:$0xff]   ;;  %v1297_v53 = vld [vmem:[#allocation11 + $0x74] ss:$8 sps:$4 sm:$0xff]   ;;  %v429_v18 = vlaneseq }
  0x91   :  { %v1295_v54 = vld [vmem:[#allocation11 + $0x70] ss:$8 sps:$4 sm:$0xff]   ;;  %v1300_v55 = vld [vmem:[#allocation11 + $0x84] ss:$8 sps:$4 sm:$0xff]   ;;  %v1298_v56 = vld [vmem:[#allocation11 + $0x80] ss:$8 sps:$4 sm:$0xff]  }
  0x92   :  { %v1303_v57 = vld [vmem:[#allocation11 + $0x94] ss:$8 sps:$4 sm:$0xff]   ;;  %v1301_v58 = vld [vmem:[#allocation11 + $0x90] ss:$8 sps:$4 sm:$0xff]   ;;  %v1306_v59 = vld [vmem:[#allocation11 + $0xa4] ss:$8 sps:$4 sm:$0xff]  }
  0x93   :  { %249 = vmatpush1.bf16.msra.mxu0 %v1254_v20  ;;  %389 = vmatpush1.bf16.msra.mxu1 %v1255_v21  ;;  %v1304_v60 = vld [vmem:[#allocation11 + $0xa0] ss:$8 sps:$4 sm:$0xff]   ;;  %v1309_v61 = vld [vmem:[#allocation11 + $0xb4] ss:$8 sps:$4 sm:$0xff]   ;;  %v1307_v62 = vld [vmem:[#allocation11 + $0xb0] ss:$8 sps:$4 sm:$0xff]  }
  0x94   :  { %250 = vmatprep.subr.bf16.mxu0 %v1256_v22  ;;  %390 = vmatprep.subr.bf16.mxu1 %v1258_v23  ;;  %v1312_v63 = vld [vmem:[#allocation11 + $0xc4] ss:$8 sps:$4 sm:$0xff]   ;;  %v1310_v0 = vld [vmem:[#allocation11 + $0xc0] ss:$8 sps:$4 sm:$0xff]   ;;  %v1315_v1 = vld [vmem:[#allocation11 + $0xd4] ss:$8 sps:$4 sm:$0xff]  }
  0x95   :  { %v1313_v2 = vld [vmem:[#allocation11 + $0xd0] ss:$8 sps:$4 sm:$0xff]   ;;  %v1318_v3 = vld [vmem:[#allocation11 + $0xe4] ss:$8 sps:$4 sm:$0xff]   ;;  %v1316_v4 = vld [vmem:[#allocation11 + $0xe0] ss:$8 sps:$4 sm:$0xff]  }
  0x96   :  { %v1321_v5 = vld [vmem:[#allocation11 + $0xf4] ss:$8 sps:$4 sm:$0xff]   ;;  %v1319_v6 = vld [vmem:[#allocation11 + $0xf0] ss:$8 sps:$4 sm:$0xff]   ;;  %v1322_v7 = vld [vmem:[#allocation12 + $0x40] sm:$0xff]   ;;  %v430_v19 = vshrl.u32 %v429_v18, 7 }
  0x97   :  { %251 = vmatpush1.bf16.msra.mxu0 %v1260_v24  ;;  %391 = vmatpush1.bf16.msra.mxu1 %v1261_v25  ;;  %v1323_v8 = vld [vmem:[#allocation12] sm:$0xff]   ;;  %v1324_v9 = vld [vmem:[#allocation12 + $0x48] sm:$0xff]   ;;  %v1326_v11 = vld [vmem:[#allocation12 + $0x50] sm:$0xff]   ;;  %vm1031_vm2 = vcmask 7168   ;;  %vm1047_vm3 = vcmask 0  }
  0x98   :  { %252 = vmatprep.subr.bf16.mxu0 %v1262_v26  ;;  %392 = vmatprep.subr.bf16.mxu1 %v1264_v27  ;;  %v1325_v10 = vld [vmem:[#allocation12 + $0x8] sm:$0xff]   ;;  %v1327_v12 = vld [vmem:[#allocation12 + $0x10] sm:$0xff]   ;;  %v1328_v13 = vld [vmem:[#allocation12 + $0x58] sm:$0xff]   ;;  %v1729_v20 = vsub.s32 0, %v430_v19  ;;  %v435_v22 = vsub.s32 1, %v430_v19 }
  0x99   :  { %v1329_v14 = vld [vmem:[#allocation12 + $0x18] sm:$0xff]   ;;  %v1330_v15 = vld [vmem:[#allocation12 + $0x60] sm:$0xff]   ;;  %v1332_v17 = vld [vmem:[#allocation12 + $0x68] sm:$0xff]  }
  0x9a   :  { %v1331_v16 = vld [vmem:[#allocation12 + $0x20] sm:$0xff]   ;;  %v427_v21 = vld [vmem:[%s1767_s5] sm:$0x3] }
  0x9b   :  { %253 = vmatpush1.bf16.msra.mxu0 %v1266_v28  ;;  %393 = vmatpush1.bf16.msra.mxu1 %v1267_v29  ;;  %v432_v23 = vrot.slane %v427_v21, %v1729_v20  ;;  %v436_v26 = vrot.slane %v427_v21, %v435_v22 }
  0x9c   :  { %254 = vmatprep.subr.bf16.mxu0 %v1268_v30  ;;  %394 = vmatprep.subr.bf16.mxu1 %v1270_v31 }
  0x9f   :  { %255 = vmatpush1.bf16.msra.mxu0 %v1272_v32  ;;  %395 = vmatpush1.bf16.msra.mxu1 %v1273_v33 }
  0xa0   :  { %653 = vmatprep.subr.bf16.mxu0 %v1276_v37  ;;  %1158 = vmatprep.subr.bf16.mxu1 %v1322_v7  ;;  %v1339_v7 = vld [vmem:[#allocation14 + $0x8] sm:$0xff]  }
  0xa2   :  { %273 = vmatmul.mubr.bf16.vlgmr.msra.gmra.mrb[0].mxu0 %v143_v38  ;;  %413 = vmatmul.mubr.bf16.vlgmr.msra.gmra.mrb[0].mxu1 %v283_v39 }
  0xa3   :  { %654 = vmatpush1.bf16.msra.mxu0 %v1274_v40  ;;  %1159 = vmatpush3.bf16.msra.mxu1 %v1323_v8  ;;  %v1340_v8 = vld [vmem:[#allocation14 + $0x10] sm:$0xff]  }
  0xa4   :  { %655 = vmatprep.subr.bf16.mxu0 %v1279_v41  ;;  %1160 = vmatprep.subr.bf16.mxu1 %v1324_v9  ;;  %v1341_v9 = vld [vmem:[#allocation14 + $0x18] sm:$0xff]  }
  0xa7   :  { %656 = vmatpush1.bf16.msra.mxu0 %v1277_v42  ;;  %1161 = vmatpush3.bf16.msra.mxu1 %v1325_v10  ;;  %v1342_v10 = vld [vmem:[#allocation14 + $0x20] sm:$0xff]  }
  0xa8   :  { %657 = vmatprep.subr.bf16.mxu0 %v1282_v43  ;;  %1162 = vmatprep.subr.bf16.mxu1 %v1326_v11  ;;  %v1343_v11 = vld [vmem:[#allocation14 + $0x28] sm:$0xff]  }
  0xab   :  { %658 = vmatpush1.bf16.msra.mxu0 %v1280_v44  ;;  %1163 = vmatpush3.bf16.msra.mxu1 %v1327_v12  ;;  %v1344_v12 = vld [vmem:[#allocation14 + $0x30] sm:$0xff]  }
  0xac   :  { %659 = vmatprep.subr.bf16.mxu0 %v1285_v45  ;;  %1164 = vmatprep.subr.bf16.mxu1 %v1328_v13  ;;  %v1345_v13 = vld [vmem:[#allocation14 + $0x38] sm:$0xff]  }
  0xaf   :  { %660 = vmatpush1.bf16.msra.mxu0 %v1283_v46  ;;  %1165 = vmatpush3.bf16.msra.mxu1 %v1329_v14 }
  0xb0   :  { %661 = vmatprep.subr.bf16.mxu0 %v1288_v47  ;;  %1166 = vmatprep.subr.bf16.mxu1 %v1330_v15  ;;  %v1333_v47 = vld [vmem:[#allocation12 + $0x28] sm:$0xff]  }
  0xb1   :  { %v1131_v15 = vld [vmem:[%s1771_s9] ss:$0 sm:$0xff] }
  0xb3   :  { %662 = vmatpush1.bf16.msra.mxu0 %v1286_v48  ;;  %1167 = vmatpush3.bf16.msra.mxu1 %v1331_v16  ;;  %v1334_v48 = vld [vmem:[#allocation12 + $0x70] sm:$0xff]  }
  0xb4   :  { %663 = vmatprep.subr.bf16.mxu0 %v1291_v49  ;;  %1168 = vmatprep.subr.bf16.mxu1 %v1332_v17  ;;  %v1335_v49 = vld [vmem:[#allocation12 + $0x30] sm:$0xff]  }
  0xb7   :  { %664 = vmatpush1.bf16.msra.mxu0 %v1289_v50  ;;  %1169 = vmatpush3.bf16.msra.mxu1 %v1333_v47  ;;  %v1336_v50 = vld [vmem:[#allocation12 + $0x78] sm:$0xff]  }
  0xb8   :  { %665 = vmatprep.subr.bf16.mxu0 %v1294_v51  ;;  %1170 = vmatprep.subr.bf16.mxu1 %v1334_v48  ;;  %v1337_v51 = vld [vmem:[#allocation12 + $0x38] sm:$0xff]   ;;  %v1005_v48 = vld [vmem:[#allocation2] sm:$0x1] }
  0xbb   :  { %666 = vmatpush1.bf16.msra.mxu0 %v1292_v52  ;;  %1171 = vmatpush3.bf16.msra.mxu1 %v1335_v49  ;;  %v1546_v52 = vmov 0.0   ;;  %v1010_v49 = vrot.slane %v1005_v48, %v1729_v20 }
  0xbc   :  { %667 = vmatprep.subr.bf16.mxu0 %v1297_v53  ;;  %1172 = vmatprep.subr.bf16.mxu1 %v1336_v50  ;;  %v481_v53 = vld [vmem:[%s1769_s7] sm:$0x3] }
  0xbf   :  { %668 = vmatpush1.bf16.msra.mxu0 %v1295_v54  ;;  %1173 = vmatpush3.bf16.msra.mxu1 %v1337_v51  ;;  %v486_v54 = vrot.slane %v481_v53, %v1729_v20 }
  0xc0   :  { %669 = vmatprep.subr.bf16.mxu0 %v1300_v55  ;;  %1189 = vmatprep.subr.bf16.mxu1 %v1546_v52  ;;  %v490_v55 = vrot.slane %v481_v53, %v435_v22 }
  0xc3   :  { %670 = vmatpush1.bf16.msra.mxu0 %v1298_v56 }
  0xc4   :  { %671 = vmatprep.subr.bf16.mxu0 %v1303_v57 }
  0xc7   :  { %672 = vmatpush1.bf16.msra.mxu0 %v1301_v58 }
  0xc8   :  { %673 = vmatprep.subr.bf16.mxu0 %v1306_v59 }
  0xcb   :  { %674 = vmatpush1.bf16.msra.mxu0 %v1304_v60 }
  0xcc   :  { %675 = vmatprep.subr.bf16.mxu0 %v1309_v61 }
  0xcf   :  { %676 = vmatpush1.bf16.msra.mxu0 %v1307_v62 }
  0xd0   :  { %677 = vmatprep.subr.bf16.mxu0 %v1312_v63 }
  0xd3   :  { %678 = vmatpush1.bf16.msra.mxu0 %v1310_v0 }
  0xd4   :  { %679 = vmatprep.subr.bf16.mxu0 %v1315_v1 }
  0xd7   :  { %680 = vmatpush1.bf16.msra.mxu0 %v1313_v2 }
  0xd8   :  { %681 = vmatprep.subr.bf16.mxu0 %v1318_v3 }
  0xdb   :  { %682 = vmatpush1.bf16.msra.mxu0 %v1316_v4 }
  0xdc   :  { %683 = vmatprep.subr.bf16.mxu0 %v1321_v5 }
  0xdf   :  { %684 = vmatpush1.bf16.msra.mxu0 %v1319_v6  ;;  %v1338_v6 = vld [vmem:[#allocation14] sm:$0xff]  }
 0x175   :  { %v274_v24 = vpop.f32.mrb[0].mxu0  ;;  %v414_v25 = vpop.f32.mrb[0].mxu1 }
 0x176   :  { %v423_v27 = vadd.f32 %v414_v25, %v274_v24  ;;  %v276_v28 = vpop.f32.mrb[1].mxu0  ;;  %v416_v29 = vpop.f32.mrb[1].mxu1 }
 0x177   :  { %v424_v30 = vadd.f32 %v416_v29, %v276_v28  ;;  %v278_v31 = vpop.f32.mrb[2].mxu0  ;;  %v418_v32 = vpop.f32.mrb[2].mxu1  ;;  %v995_v29 = vld [vmem:[%s1774_s12] sm:$0x1]  ;;  %s1548_s12 = smov [#allocation15]  }
 0x178   :  { %v439_v33 = vadd.f32 %v432_v23, %v423_v27  ;;  %v425_v34 = vadd.f32 %v418_v32, %v274_v24  ;;  %v279_v35 = vpop.f32.mrb[3].mxu0  ;;  %v420_v36 = vpop.f32.mrb[3].mxu1  ;;  %v1148_v27 = vld [vmem:[%s1773_s11] ss:$0 sm:$0xff]  ;;  %s1055_s23 = sshll.u32 %s1548_s12, 4  ;;  %s1056_s23 = int_to_ptr.vmem [resolvable:$true] %s1055_s23 }
 0x179   :  { %v440_v37 = vadd.f32 %v436_v26, %v424_v30  ;;  %v426_v38 = vadd.f32 %v420_v36, %v276_v28  ;;  %v1000_v36 = vrot.slane %v995_v29, %v1729_v20  ;;  %s1502_s24 = scalar_lea.vmem %s1056_s23, 16  ;;  %s1506_s3 = scalar_lea.vmem %s1056_s23, 32 }
 0x17a   :  { %v441_v39 = vadd.f32 %v432_v23, %v425_v34  ;;  %v443_v41 = vmax.f32 %v439_v33, 0.0  ;;  %p1503_p0 = scmp.ne.s32.totalorder %s1056_s23, %s1502_s24  ;;  %p1507_p1 = scmp.lt.s32.totalorder %s1056_s23, %s1056_s23 }
 0x17b   :  { %v442_v40 = vadd.f32 %v436_v26, %v426_v38  ;;  %v444_v43 = vmax.f32 %v440_v37, 0.0  ;;  %p1508_p2 = scmp.lt.s32.totalorder %s1506_s3, %s1502_s24 }
 0x17c   :  { %v445_v42 = vmax.f32 %v441_v39, 0.0 }
 0x17d   :  { %v446_v44 = vmax.f32 %v442_v40, 0.0  ;;  %p1509_p3 = por %p1508_p2, %p1507_p1 }
 0x17e   :  { %v447_v45 = vpack.c.bf16 %v445_v42, %v443_v41 }
 0x17f   :  { %v448_v46 = vpack.c.bf16 %v446_v44, %v444_v43  ;;  %p1510_p4 = pnand %p1509_p3, %p1503_p0 }
 0x181   :  { %685 = vmatprep.mubr.bf16.mxu0 %v448_v46 }
 0x182   :  { %686 = vmatmul.mubr.bf16.vlgmr.msra.gmra.mrb[4].mxu0 %v447_v45 }
 0x255   :  { %v687_v56 = vpop.f32.mrb[4].mxu0 }
 0x256   :  { %v688_v57 = vadd.f32 %v687_v56, %v486_v54  ;;  %v689_v58 = vpop.f32.mrb[5].mxu0 }
 0x257   :  { %v690_v59 = vadd.f32 %v689_v58, %v490_v55  ;;  %v691_v60 = vpop.f32.mrb[6].mxu0 }
 0x258   :  { %v692_v61 = vadd.f32 %v691_v60, %v486_v54  ;;  %v693_v62 = vpop.f32.mrb[7].mxu0  ;;  %v696_v0 = vmax.f32 %v688_v57, 0.0 }
 0x259   :  { %v694_v63 = vadd.f32 %v693_v62, %v490_v55  ;;  %v697_v2 = vmax.f32 %v690_v59, 0.0 }
 0x25a   :  { %v698_v1 = vmax.f32 %v692_v61, 0.0 }
 0x25b   :  { %v699_v3 = vmax.f32 %v694_v63, 0.0 }
 0x25c   :  { %v700_v4 = vpack.c.bf16 %v698_v1, %v696_v0 }
 0x25d   :  { %v701_v5 = vpack.c.bf16 %v699_v3, %v697_v2 }
 0x25f   :  { %869 = vmatprep.mubr.bf16.mxu1 %v701_v5 }
 0x260   :  { %870 = vmatmul.mubr.bf16.vlgmr.msra.gmra.mrb[4].mxu1 %v700_v4 }
 0x261   :  { %1190 = vmatpush3.bf16.msra.mxu1 %v1338_v6  ;;  %1205 = vmatprep.mubr.msk.bf16.mxu1 %vm1547_vm0, %v1546_v52 }
 0x262   :  { %1191 = vmatprep.subr.bf16.mxu1 %v1546_v52 }
 0x265   :  { %1192 = vmatpush3.bf16.msra.mxu1 %v1339_v7 }
 0x266   :  { %1193 = vmatprep.subr.bf16.mxu1 %v1546_v52 }
 0x269   :  { %1194 = vmatpush3.bf16.msra.mxu1 %v1340_v8 }
 0x26a   :  { %1195 = vmatprep.subr.bf16.mxu1 %v1546_v52 }
 0x26d   :  { %1196 = vmatpush3.bf16.msra.mxu1 %v1341_v9 }
 0x26e   :  { %1197 = vmatprep.subr.bf16.mxu1 %v1546_v52 }
 0x271   :  { %1198 = vmatpush3.bf16.msra.mxu1 %v1342_v10 }
 0x272   :  { %1199 = vmatprep.subr.bf16.mxu1 %v1546_v52 }
 0x275   :  { %1200 = vmatpush3.bf16.msra.mxu1 %v1343_v11 }
 0x276   :  { %1201 = vmatprep.subr.bf16.mxu1 %v1546_v52 }
 0x279   :  { %1202 = vmatpush3.bf16.msra.mxu1 %v1344_v12 }
 0x27a   :  { %1203 = vmatprep.subr.bf16.mxu1 %v1546_v52 }
 0x27d   :  { %1204 = vmatpush3.bf16.msra.mxu1 %v1345_v13 }
 0x333   :  { %v1174_v14 = vpop.f32.mrb[4].mxu1 }
 0x334   :  { %v1175_v16 = vpop.f32.mrb[5].mxu1 }
 0x335   :  { %v1176_v17 = vadd.f32 %v1175_v16, %v1174_v14  ;;  %v1177_v18 = vpop.f32.mrb[6].mxu1 }
 0x336   :  { %v1178_v19 = vpop.f32.mrb[7].mxu1 }
 0x337   :  { %v872_v21 = vadd.f32 %v1176_v17, %v1131_v15  ;;  %v1179_v22 = vadd.f32 %v1178_v19, %v1177_v18 }
 0x339   :  { %v875_v23 = vadd.f32 %v1179_v22, %v1131_v15  ;;  %v878_v24 = vmax.f32 %v872_v21, 0.0 }
 0x33b   :  { %v879_v25 = vmax.f32 %v875_v23, 0.0 }
 0x33d   :  { %v880_v26 = vpack.c.bf16 %v879_v25, %v878_v24 }
 0x33f   :  { %1206 = vmatmul.mubr.bf16.vlgmr.msra.gmra.mrb[8].mxu1 %v880_v26 }
 0x412   :  { %v986_v28 = vpop.f32.mrb[8].mxu1 }
 0x413   :  { %v987_v30 = vadd.f32 %v1148_v27, %v986_v28  ;;  %v1207_v31 = vpop.f32.mrb[9].mxu1 }
 0x414   :  { %v989_v32 = vpop.f32.mrb[10].mxu1 }
 0x415   :  { %v993_v33 = vmax.f32 %v987_v30, 0.0  ;;  %v990_v34 = vadd.f32 %v1148_v27, %v989_v32  ;;  %v1208_v35 = vpop.f32.mrb[11].mxu1 }
 0x417   :  { %v1013_v37 = vrot.slane %v993_v33, 4  ;;  %v994_v38 = vmax.f32 %v990_v34, 0.0 }
 0x419   :  { %v1014_v39 = vadd.f32 %v1013_v37, %v993_v33  ;;  %v1002_v40 = vmul.f32 %v1000_v36, %v994_v38 }
 0x41b   :  { %v1015_v41 = vrot.slane %v1014_v39, 2  ;;  %1003 = vadd.xlane.f32.xlu0 %v1002_v40 }
 0x41d   :  { %v1016_v42 = vadd.f32 %v1015_v41, %v1014_v39 }
 0x41f   :  { %v1017_v43 = vrot.slane %v1016_v42, 1 }
 0x421   :  { %v1018_v44 = vadd.f32 %v1017_v43, %v1016_v42 }
 0x423   :  { %v1020_v45 = vmul.f32 0.125, %v1018_v44 }
 0x425   :  { %v1021_v46 = vmul.f32 %v1020_v45, %v995_v29 }
 0x427   :  { %v1023_v47 = vsel %vm1022_vm1, %v1021_v46, 0.0 }
 0x428   :  { %1024 = vadd.xlane.f32.xlu1 %v1023_v47 }
 0x4a8   :  { %v1004_v50 = vpop.xlane.xlu0 %1003 }
 0x4a9   :  { %v1012_v51 = vadd.f32 %v1010_v49, %v1004_v50 }
 0x4ab   :  { %v1157_v52 = vadd.f32 -1.0, %v1012_v51 }
 0x4ad   :  { %v1029_v53 = vmul.f32 1.442695, %v1157_v52 }
 0x4af   :  { %1346 = vpow2.f32 %v1029_v53 }
 0x4b5   :  { %v1025_v63 = vpop.xlane.xlu1 %1024 }
 0x4b6   :  { %v1026_v0 = vadd.f32 %v1025_v63, %v1005_v48 }
 0x4b8   :  { %v1027_v20 = vsub.f32 0.0, %v1026_v0 }
 0x4b9   :  { %v1347_v54 = vpop.eup %1346 }
 0x4ba   :  { %v1032_v55 = vsel %vm1031_vm2, %v1347_v54, 0.0 }
 0x4bb   :  { %1033 = vadd.xlane.f32.xlu0 %v1032_v55 }
 0x548   :  { %v1034_v56 = vpop.xlane.xlu0 %1033 }
 0x549   :  { %v1035_v57 = vrot.slane %v1034_v56, 4 }
 0x54b   :  { %v1036_v58 = vadd.f32 %v1035_v57, %v1034_v56 }
 0x54d   :  { %v1037_v59 = vrot.slane %v1036_v58, 2 }
 0x54f   :  { %v1038_v60 = vadd.f32 %v1037_v59, %v1036_v58 }
 0x551   :  { %v1039_v61 = vrot.slane %v1038_v60, 1 }
 0x553   :  { %v1040_v62 = vadd.f32 %v1039_v61, %v1038_v60 }
 0x555   :  { %1209 = vpush %v1040_v62 }
 0x586   :  { %s1210_s9 = spop %1209 }
 0x587   :  { %s1044_s11 = smul.f32 0.125, %s1210_s9 }
 0x589   :  { %v1045_v1 = vstv %s1044_s11 }
 0x58a   :  { %v1046_v2 = vadd.f32 %v1045_v1, %v1027_v20 }
 0x58c   :  { %1048 = vst.msk [vmem:[#allocation15] sm:$0x1] %vm1047_vm3, %v1046_v2 }
 0x58d   :  { %1513 = shalt.err (!%p1510_p4)
}
 0x58e   :  { %s1514_s26 = scalar_lea.hbm %s1776_s14, 16 }
 0x58f   :  { %p1515_p5 = scmp.ne.s32.totalorder %s1776_s14, %s1514_s26  ;;  %p1518_p6 = scmp.lt.u32.totalorder %s1514_s26, %s1776_s14 }
 0x591   :  { %p1520_p7 = pnand %p1518_p6, %p1515_p5 }
 0x593   :  { %1523 = shalt.err (!%p1520_p7)
}
 0x594   :  { %1058 = dma.vmem_to_hbm [thread:$0]  %s1056_s23, 16, %s1776_s14, [#allocation5]  }
 0x595   :  { %1532 = dma.done.wait [#allocation5], 16  }
 0x596   :  { %1533 = vsyncadd [#allocation5], 4294967280 }
 0x597   :  { %1062 = vsyncpa [#allocation4], 1 }
 0x598   :  { %1063 = vsyncpa [#allocation7], 1 }
 0x599   :  { %1064 = vsyncpa [#allocation10], 1 }
 0x59a   :  { %1065 = vsyncpa [#allocation13], 1 }
 0x59b   :  { %1066 = vsyncpa [#allocation5], 1 }

</bundles_post_ra>
